<compile_context>
chip_gen: v7x
topology: tpu7x:2x2x1
jax: 0.10.0
libtpu: 0.0.40
codegen_flags: <defaults>
</compile_context>

<pallas_src>
import jax
import jax.numpy as jnp
from jax.experimental import pallas as pl
from jax.experimental.pallas import tpu as pltpu


_TARGET_STEPS = 8                    # aim for >= this many grid steps when bs allows
_MIN_HEADROOM = 4 * 1024 * 1024      # extra slack on top of the accounted VMEM need


# ---------------------------------------------------------------------------
# Kernels
# ---------------------------------------------------------------------------

def _se_kernel_3d(x_ref, w1t_ref, w2t_ref, o_ref):
    """Block layout (Bt, C, L). Used when L is already lane-dense for the
    input dtype (or the flat path's constants would be too large)."""
    x = x_ref[...]                                                    # (Bt, C, L)
    # squeeze: per-channel sum, f32 accumulation (1/L is folded into w1t)
    y = jnp.sum(x, axis=-1, dtype=jnp.float32)                        # (Bt, C) f32
    # excitation: Linear -> ReLU -> Linear -> Sigmoid (bias-free)
    h = jnp.maximum(jnp.dot(y, w1t_ref[...], preferred_element_type=jnp.float32), 0.0)
    s = jax.nn.sigmoid(jnp.dot(h, w2t_ref[...], preferred_element_type=jnp.float32))
    # scale: broadcast the per-channel gate over L, in the input dtype
    o_ref[...] = x * s.astype(x.dtype)[:, :, None]


def _se_kernel_flat(x_ref, pool_ref, w1t_ref, w2t_ref, expand_ref, o_ref):
    """Lane-dense block layout (Bt, C*L). The channel mean and the gate
    broadcast are small MXU matmuls against constant 0/1 segment matrices, so
    the large tile only sees lane-dense (unmasked) loads/stores."""
    x = x_ref[...]                                                    # (Bt, C*L)
    dt = x_ref.dtype
    # squeeze: segment-sum over each channel's L columns (1/L folded into w1t)
    y = jnp.dot(x, pool_ref[...], preferred_element_type=jnp.float32)             # (Bt, C) f32
    # excitation
    h = jnp.maximum(jnp.dot(y, w1t_ref[...], preferred_element_type=jnp.float32), 0.0)
    s = jax.nn.sigmoid(jnp.dot(h, w2t_ref[...], preferred_element_type=jnp.float32))
    # gate broadcast back to (Bt, C*L) directly in the input dtype
    # (exact: expand has a single 1 per column)
    g = jnp.dot(s.astype(dt), expand_ref[...], preferred_element_type=dt)          # (Bt, C*L)
    o_ref[...] = x * g


# ---------------------------------------------------------------------------
# Sizing helpers
# ---------------------------------------------------------------------------

def _tpu_vmem_capacity_bytes():
    """Physical VMEM per core; conservative fallback (64 MiB = v7x)."""
    try:
        info = pltpu.get_tpu_info()
        cap = getattr(info, "vmem_capacity_bytes", None)
        if cap:
            return int(cap)
    except Exception:
        pass
    return 64 * 1024 * 1024


def _ceil_to(a, m):
    return -(-a // m) * m


def _sublane_multiple(dtype):
    # second-minor block granularity: 8 (f32), 16 (bf16), 32 (int8/fp8)
    return 8 * max(1, 4 // jnp.dtype(dtype).itemsize)


def _choose_batch_tile(bs, row_bytes, sub, block_budget):
    """Pick the batch tile.

    Returns (bt, bs_pad, sublane_ok); sublane_ok means bt is a legal
    second-minor block dim for the flat (Bt, C*L) layout (multiple of `sub`
    or the full padded batch)."""
    cap = block_budget // (4 * row_bytes)          # 2x in + 2x out pipeline buffers
    if cap < 1:
        # A single row does not fit the conservative budget; the path code
        # re-checks against the real usable VMEM and raises if hopeless.
        return 1, bs, False
    if bs <= sub:
        if cap >= bs:
            return bs, bs, True                    # one full-batch block
        bt = int(cap)
        return bt, _ceil_to(bs, bt), False
    if cap < sub:
        bt = int(min(cap, bs))
        return bt, _ceil_to(bs, bt), False
    bt_vmem = (int(cap) // sub) * sub
    bt_steps = _ceil_to(max(1, bs // _TARGET_STEPS), sub)   # >= _TARGET_STEPS grid steps
    bt = min(bt_vmem, bt_steps, _ceil_to(bs, sub))
    return bt, _ceil_to(bs, bt), True


def _vmem_limit(needed, usable):
    if needed + _MIN_HEADROOM > usable:
        raise NotImplementedError(
            "TODO(synk): SE tile exceeds the per-core VMEM budget; needs a "
            "two-phase grid over L (partial-sum pass + gated rescale pass).")
    return int(min(max(needed + _MIN_HEADROOM, 32 * 1024 * 1024), usable))


# ---------------------------------------------------------------------------
# pallas_call wrappers
# ---------------------------------------------------------------------------

def _se_block_3d(x, w1t, w2t, bt, usable_vmem, alias):
    bs_pad, c, L = x.shape
    h = w1t.shape[1]
    itemsize = jnp.dtype(x.dtype).itemsize
    tile = bt * c * L * itemsize
    w_bytes = 4 * (w1t.size + w2t.size)
    # 2x in + 2x out pipeline buffers, ~2 tiles of in-kernel temporaries
    # (reduce staging / gated product), double-buffered weights.
    needed = 6 * tile + 2 * w_bytes
    vmem_limit = _vmem_limit(needed, usable_vmem)
    cost = pl.CostEstimate(
        flops=int(4 * bs_pad * c * h + 2 * bs_pad * c * L),
        transcendentals=int(bs_pad * c),
        bytes_accessed=int(2 * bs_pad * c * L * itemsize + w_bytes),
    )
    kwargs = {"input_output_aliases": {0: 0}} if alias else {}
    return pl.pallas_call(
        _se_kernel_3d,
        out_shape=jax.ShapeDtypeStruct((bs_pad, c, L), x.dtype),
        grid_spec=pltpu.PrefetchScalarGridSpec(
            num_scalar_prefetch=0,
            grid=(bs_pad // bt,),
            in_specs=[
                pl.BlockSpec((bt, c, L), lambda b: (b, 0, 0)),
                pl.BlockSpec((c, h), lambda b: (0, 0)),
                pl.BlockSpec((h, c), lambda b: (0, 0)),
            ],
            out_specs=pl.BlockSpec((bt, c, L), lambda b: (b, 0, 0)),
        ),
        compiler_params=pltpu.CompilerParams(
            dimension_semantics=("parallel",),
            vmem_limit_bytes=vmem_limit,
        ),
        cost_estimate=cost,
        **kwargs,
    )(x, w1t, w2t)


def _se_block_flat(x2, pool, expand, w1t, w2t, bt, usable_vmem, alias):
    bs_pad, cl = x2.shape
    c, h = w1t.shape
    itemsize = jnp.dtype(x2.dtype).itemsize
    tile = bt * cl * itemsize
    const_bytes = (pool.size + expand.size) * itemsize
    w_bytes = 4 * (w1t.size + w2t.size)
    # 2x in + 2x out pipeline buffers + gate tile + ~1 tile of temporaries,
    # double-buffered constants/weights.
    needed = 6 * tile + 2 * const_bytes + 2 * w_bytes
    vmem_limit = _vmem_limit(needed, usable_vmem)
    cost = pl.CostEstimate(
        flops=int(4 * bs_pad * cl * c + 4 * bs_pad * c * h + bs_pad * cl),
        transcendentals=int(bs_pad * c),
        bytes_accessed=int(2 * bs_pad * cl * itemsize + const_bytes + w_bytes),
    )
    kwargs = {"input_output_aliases": {0: 0}} if alias else {}
    return pl.pallas_call(
        _se_kernel_flat,
        out_shape=jax.ShapeDtypeStruct((bs_pad, cl), x2.dtype),
        grid_spec=pltpu.PrefetchScalarGridSpec(
            num_scalar_prefetch=0,
            grid=(bs_pad // bt,),
            in_specs=[
                pl.BlockSpec((bt, cl), lambda b: (b, 0)),
                pl.BlockSpec((cl, c), lambda b: (0, 0)),
                pl.BlockSpec((c, h), lambda b: (0, 0)),
                pl.BlockSpec((h, c), lambda b: (0, 0)),
                pl.BlockSpec((c, cl), lambda b: (0, 0)),
            ],
            out_specs=pl.BlockSpec((bt, cl), lambda b: (b, 0)),
        ),
        compiler_params=pltpu.CompilerParams(
            dimension_semantics=("parallel",),
            vmem_limit_bytes=vmem_limit,
        ),
        cost_estimate=cost,
        **kwargs,
    )(x2, pool, w1t, w2t, expand)


# ---------------------------------------------------------------------------
# Public entry point
# ---------------------------------------------------------------------------

def se_block(x, w1, w2, donate_input=False):
    """SEBlock forward.  x: (bs, c, L); w1: (c//r, c), w2: (c, c//r) in PyTorch
    Linear weight layout (both bias-free).  donate_input=True allows the kernel
    to overwrite x's HBM buffer in place (only safe if the caller never reuses
    x, e.g. no residual/backward reuse)."""
    bs, c, L = x.shape
    h = w1.shape[0]
    assert w1.shape == (h, c) and w2.shape == (c, h)
    itemsize = jnp.dtype(x.dtype).itemsize
    cl = c * L

    # Fold 1/L into the first excitation matmul so the pooled sums need no
    # extra VPU scaling and pool/expand stay exact 0/1 in the input dtype.
    w1t = w1.T.astype(jnp.float32) / jnp.float32(L)      # (c, h)
    w2t = w2.T.astype(jnp.float32)                       # (h, c)

    vmem_cap = _tpu_vmem_capacity_bytes()
    usable_vmem = (vmem_cap * 3) // 4          # stay below physical VMEM on every gen
    block_budget = vmem_cap // 4               # double-buffered in+out x blocks
    flat_const_budget = vmem_cap // 16         # pool + expand constants

    sub = _sublane_multiple(x.dtype)
    row_bytes = cl * itemsize
    bt, bs_pad, sublane_ok = _choose_batch_tile(bs, row_bytes, sub, block_budget)

    # Lane-dense flattened path when the 3-D layout would be lane-sparse
    # (L not a multiple of 128) or x is a packed dtype (v5e has no bf16 VPU;
    # the MXU segment-sum sidesteps a full-tile f32 upcast).
    const_bytes = 2 * cl * c * itemsize
    use_flat = (sublane_ok
                and const_bytes <= flat_const_budget
                and (L % 128 != 0 or itemsize < 4))

    if bs_pad != bs:
        x = jnp.pad(x, ((0, bs_pad - bs), (0, 0), (0, 0)))
    # In-place aliasing is safe when the kernel input is a freshly padded
    # temporary; otherwise it is opt-in only (review correctness concern).
    alias = bool(donate_input) or (bs_pad != bs)

    if use_flat:
        x2 = x.reshape(bs_pad, cl)                                   # contiguous, free
        chan = jnp.arange(cl, dtype=jnp.int32) // L                  # channel id per flat col
        cid = jnp.arange(c, dtype=jnp.int32)
        pool = (chan[:, None] == cid[None, :]).astype(x.dtype)       # (cl, c) 0/1
        expand = (cid[:, None] == chan[None, :]).astype(x.dtype)     # (c, cl) 0/1
        out = _se_block_flat(x2, pool, expand, w1t, w2t, bt, usable_vmem, alias)
        out = out.reshape(bs_pad, c, L)
    else:
        out = _se_block_3d(x, w1t, w2t, bt, usable_vmem, alias)

    if bs_pad != bs:
        out = out[:bs]
    return out


def se_block_ref(x, w1, w2):
    """Pure-JAX reference mirroring the PyTorch SEBlock forward."""
    y = jnp.mean(x.astype(jnp.float32), axis=-1)                 # (bs, c)
    hdn = jnp.maximum(y @ w1.T.astype(jnp.float32), 0.0)         # (bs, c//r)
    s = jax.nn.sigmoid(hdn @ w2.T.astype(jnp.float32))           # (bs, c)
    return (x * s[:, :, None].astype(x.dtype)).astype(x.dtype)


if __name__ == "__main__":
    key = jax.random.PRNGKey(0)

    # Shapes consistent with SEBlock inside DNetConvBlock: x is (bs, c, L), r = 8.
    bs, c, L, r = 2, 32, 16, 8
    hidden = c // r

    kx, k1, k2, kx2, kx3 = jax.random.split(key, 5)
    x = jax.random.normal(kx, (bs, c, L), dtype=jnp.float32)
    # PyTorch Linear weight layout (out_features, in_features)
    w1 = jax.random.normal(k1, (hidden, c), dtype=jnp.float32) * 0.1
    w2 = jax.random.normal(k2, (c, hidden), dtype=jnp.float32) * 0.1

    # L = 16 -> exercises the lane-dense flattened path (single full-batch block).
    out = jax.block_until_ready(se_block(x, w1, w2))
    ref = se_block_ref(x, w1, w2)
    assert out.shape == x.shape
    assert jnp.allclose(out, ref, atol=1e-3, rtol=1e-3), "flat-path mismatch vs reference"

    # L = 256 (multiple of 128) -> exercises the batched 3-D path.
    bs2, L2 = 4, 256
    xb = jax.random.normal(kx2, (bs2, c, L2), dtype=jnp.float32)
    out2 = jax.block_until_ready(se_block(xb, w1, w2))
    ref2 = se_block_ref(xb, w1, w2)
    assert out2.shape == xb.shape
    assert jnp.allclose(out2, ref2, atol=1e-3, rtol=1e-3), "3d-path mismatch vs reference"

    # bs = 12, L = 48 -> exercises batch padding + multi-step grid on the flat path.
    bs3, L3 = 12, 48
    xc = jax.random.normal(kx3, (bs3, c, L3), dtype=jnp.float32)
    out3 = jax.block_until_ready(se_block(xc, w1, w2))
    ref3 = se_block_ref(xc, w1, w2)
    assert out3.shape == xc.shape
    assert jnp.allclose(out3, ref3, atol=1e-3, rtol=1e-3), "padded-path mismatch vs reference"

    print("KERNEL_OK")
</pallas_src>

<mosaic_0001>
module attributes {stable_mosaic.version = 11 : i64} {
  func.func @_se_kernel_flat(%arg0: i32, %arg1: memref<2x512xf32, #tpu.memory_space<vmem>>, %arg2: memref<512x32xf32, #tpu.memory_space<vmem>>, %arg3: memref<32x4xf32, #tpu.memory_space<vmem>>, %arg4: memref<4x32xf32, #tpu.memory_space<vmem>>, %arg5: memref<32x512xf32, #tpu.memory_space<vmem>>, %arg6: memref<2x512xf32, #tpu.memory_space<vmem>>) attributes {dimension_semantics = [#tpu.dimension_semantics<parallel>], iteration_bounds = array<i64: 1>, scalar_prefetch = 0 : i64, scratch_operands = 0 : i64, tpu.core_type = #tpu.core_type<tc>, window_params = [{transform_indices = @transform_0, window_bounds = array<i64: 2, 512>}, {pipeline_mode = #tpu.pipeline_mode<synchronous>, transform_indices = @transform_1, window_bounds = array<i64: 512, 32>}, {pipeline_mode = #tpu.pipeline_mode<synchronous>, transform_indices = @transform_2, window_bounds = array<i64: 32, 4>}, {pipeline_mode = #tpu.pipeline_mode<synchronous>, transform_indices = @transform_3, window_bounds = array<i64: 4, 32>}, {pipeline_mode = #tpu.pipeline_mode<synchronous>, transform_indices = @transform_4, window_bounds = array<i64: 32, 512>}, {transform_indices = @transform_5, window_bounds = array<i64: 2, 512>}]} {
    %c0 = arith.constant 0 : index
    %c0_0 = arith.constant 0 : index
    %0 = vector.load %arg1[%c0, %c0_0] : memref<2x512xf32, #tpu.memory_space<vmem>>, vector<2x512xf32>
    %c0_1 = arith.constant 0 : index
    %c0_2 = arith.constant 0 : index
    %1 = vector.load %arg2[%c0_1, %c0_2] : memref<512x32xf32, #tpu.memory_space<vmem>>, vector<512x32xf32>
    %cst = arith.constant dense<0.000000e+00> : vector<2x32xf32>
    %2 = tpu.matmul %0, %1, %cst {dimension_numbers = #tpu.dot_dimension_numbers<[1], [0], [0], [1], [0, 0, 1, 1], [], []>} : vector<2x512xf32>, vector<512x32xf32>, vector<2x32xf32> -> vector<2x32xf32>
    %c0_3 = arith.constant 0 : index
    %c0_4 = arith.constant 0 : index
    %3 = vector.load %arg3[%c0_3, %c0_4] : memref<32x4xf32, #tpu.memory_space<vmem>>, vector<32x4xf32>
    %cst_5 = arith.constant dense<0.000000e+00> : vector<2x4xf32>
    %4 = tpu.matmul %2, %3, %cst_5 {dimension_numbers = #tpu.dot_dimension_numbers<[1], [0], [0], [1], [0, 0, 1, 1], [], []>} : vector<2x32xf32>, vector<32x4xf32>, vector<2x4xf32> -> vector<2x4xf32>
    %cst_6 = arith.constant 0.000000e+00 : f32
    %5 = vector.broadcast %cst_6 : f32 to vector<2x4xf32>
    %6 = arith.maximumf %4, %5 : vector<2x4xf32>
    %c0_7 = arith.constant 0 : index
    %c0_8 = arith.constant 0 : index
    %7 = vector.load %arg4[%c0_7, %c0_8] : memref<4x32xf32, #tpu.memory_space<vmem>>, vector<4x32xf32>
    %cst_9 = arith.constant dense<0.000000e+00> : vector<2x32xf32>
    %8 = tpu.matmul %6, %7, %cst_9 {dimension_numbers = #tpu.dot_dimension_numbers<[1], [0], [0], [1], [0, 0, 1, 1], [], []>} : vector<2x4xf32>, vector<4x32xf32>, vector<2x32xf32> -> vector<2x32xf32>
    %9 = arith.negf %8 : vector<2x32xf32>
    %10 = math.exp %9 : vector<2x32xf32>
    %cst_10 = arith.constant 1.000000e+00 : f32
    %11 = vector.broadcast %cst_10 : f32 to vector<2x32xf32>
    %12 = arith.addf %11, %10 : vector<2x32xf32>
    %13 = arith.divf %11, %12 : vector<2x32xf32>
    %c0_11 = arith.constant 0 : index
    %c0_12 = arith.constant 0 : index
    %14 = vector.load %arg5[%c0_11, %c0_12] : memref<32x512xf32, #tpu.memory_space<vmem>>, vector<32x512xf32>
    %cst_13 = arith.constant dense<0.000000e+00> : vector<2x512xf32>
    %15 = tpu.matmul %13, %14, %cst_13 {dimension_numbers = #tpu.dot_dimension_numbers<[1], [0], [0], [1], [0, 0, 1, 1], [], []>} : vector<2x32xf32>, vector<32x512xf32>, vector<2x512xf32> -> vector<2x512xf32>
    %16 = arith.mulf %0, %15 : vector<2x512xf32>
    %c0_14 = arith.constant 0 : index
    %c0_15 = arith.constant 0 : index
    %17 = vector.load %arg6[%c0_14, %c0_15] : memref<2x512xf32, #tpu.memory_space<vmem>>, vector<2x512xf32>
    tpu.vector_store %arg6[%c0_14, %c0_15], %16 {strides = array<i32>} : memref<2x512xf32, #tpu.memory_space<vmem>>, vector<2x512xf32>,
    return
  }
  func.func @transform_0(%arg0: i32) -> (i32, i32) {
    %c0_i32 = arith.constant 0 : i32
    %c0_i32_0 = arith.constant 0 : i32
    return %arg0, %c0_i32 : i32, i32
  }
  func.func @transform_1(%arg0: i32) -> (i32, i32) {
    %c0_i32 = arith.constant 0 : i32
    %c0_i32_0 = arith.constant 0 : i32
    %c0_i32_1 = arith.constant 0 : i32
    return %c0_i32, %c0_i32_0 : i32, i32
  }
  func.func @transform_2(%arg0: i32) -> (i32, i32) {
    %c0_i32 = arith.constant 0 : i32
    %c0_i32_0 = arith.constant 0 : i32
    %c0_i32_1 = arith.constant 0 : i32
    return %c0_i32, %c0_i32_0 : i32, i32
  }
  func.func @transform_3(%arg0: i32) -> (i32, i32) {
    %c0_i32 = arith.constant 0 : i32
    %c0_i32_0 = arith.constant 0 : i32
    %c0_i32_1 = arith.constant 0 : i32
    return %c0_i32, %c0_i32_0 : i32, i32
  }
  func.func @transform_4(%arg0: i32) -> (i32, i32) {
    %c0_i32 = arith.constant 0 : i32
    %c0_i32_0 = arith.constant 0 : i32
    %c0_i32_1 = arith.constant 0 : i32
    return %c0_i32, %c0_i32_0 : i32, i32
  }
  func.func @transform_5(%arg0: i32) -> (i32, i32) {
    %c0_i32 = arith.constant 0 : i32
    %c0_i32_0 = arith.constant 0 : i32
    return %arg0, %c0_i32 : i32, i32
  }
}

</mosaic_0001>

<bundles_post_ra>
// kernel: tpu_custom_call.1
= control target key start
LH: loop header
LB: loop body
LE: loop exit
PB: predicated region body
PF: predicated region fallthrough
CT: control target
= control target key end

     0   :  { %v830_v47 = vmov 1983009808   ;;  %v91_v49 = vlaneseq  ;;  %s1150_s0 = inlined_call_operand.vmem [shape: f32[2,512], index: 0, kind: input, shape index: {}]   ;;  %s1151_s1 = inlined_call_operand.vmem [shape: f32[512,32], index: 1, kind: input, shape index: {}]   ;;  %s1152_s2 = inlined_call_operand.vmem [shape: f32[32,4], index: 2, kind: input, shape index: {}]   ;;  %s1153_s3 = inlined_call_operand.vmem [shape: f32[4,32], index: 3, kind: input, shape index: {}]   ;;  %s1154_s4 = inlined_call_operand.vmem [shape: f32[32,512], index: 4, kind: input, shape index: {}]   ;;  %s1155_s5 = inlined_call_operand.hbm [shape: f32[2,512], index: 5, kind: output, shape index: {}]  }
   0x1   :  { %v38_v0 = vld [vmem:[%s1151_s1 + $0x80] sm:$0xff]  ;;  %v39_v1 = vld [vmem:[%s1151_s1 + $0x88] sm:$0xff]  ;;  %v40_v11 = vld [vmem:[%s1151_s1 + $0x90] sm:$0xff]  ;;  %v89_v48 = vunpack.c.l.s4 %v830_v47 }
   0x2   :  { %v70_v2 = vld [vmem:[%s1151_s1 + $0x180] sm:$0xff]  ;;  %v710_v3 = vpack.c.bf16 %v39_v1, %v38_v0  ;;  %v71_v4 = vld [vmem:[%s1151_s1 + $0x188] sm:$0xff]  ;;  %v41_v13 = vld [vmem:[%s1151_s1 + $0x98] sm:$0xff]  ;;  %v92_v0 = vshrl.u32 %v91_v49, 7 }
   0x3   :  { %v22_v5 = vld [vmem:[%s1151_s1] sm:$0xff]  ;;  %v23_v6 = vld [vmem:[%s1151_s1 + $0x8] sm:$0xff]  ;;  %v742_v7 = vpack.c.bf16 %v71_v4, %v70_v2  ;;  %v72_v14 = vld [vmem:[%s1151_s1 + $0x190] sm:$0xff]  ;;  %v714_v16 = vpack.c.bf16 %v41_v13, %v40_v11  ;;  %v90_v63 = vunpack.c.0.s8 %v89_v48 }
   0x4   :  { %v712_v8 = vpack.c.bf16 %v23_v6, %v22_v5  ;;  %v54_v9 = vld [vmem:[%s1151_s1 + $0x100] sm:$0xff]  ;;  %v55_v10 = vld [vmem:[%s1151_s1 + $0x108] sm:$0xff]  ;;  %711 = vmatprep.subr.bf16.mxu0 %v710_v3  ;;  %v73_v15 = vld [vmem:[%s1151_s1 + $0x198] sm:$0xff] }
   0x5   :  { %v744_v12 = vpack.c.bf16 %v55_v10, %v54_v9  ;;  %743 = vmatprep.subr.bf16.mxu1 %v742_v7  ;;  %v746_v17 = vpack.c.bf16 %v73_v15, %v72_v14  ;;  %v24_v18 = vld [vmem:[%s1151_s1 + $0x10] sm:$0xff]  ;;  %v25_v19 = vld [vmem:[%s1151_s1 + $0x18] sm:$0xff]  ;;  %v42_v23 = vld [vmem:[%s1151_s1 + $0xa0] sm:$0xff]  ;;  %v1015_v13 = vsub.s32 %v90_v63, %v92_v0 }
   0x6   :  { %713 = vmatpush3.bf16.msra.mxu0 %v712_v8  ;;  %v56_v20 = vld [vmem:[%s1151_s1 + $0x110] sm:$0xff]  ;;  %v716_v21 = vpack.c.bf16 %v25_v19, %v24_v18  ;;  %v57_v22 = vld [vmem:[%s1151_s1 + $0x118] sm:$0xff]  ;;  %v43_v24 = vld [vmem:[%s1151_s1 + $0xa8] sm:$0xff] }
   0x7   :  { %745 = vmatpush3.bf16.msra.mxu1 %v744_v12  ;;  %715 = vmatprep.subr.bf16.mxu0 %v714_v16  ;;  %v748_v25 = vpack.c.bf16 %v57_v22, %v56_v20  ;;  %v718_v26 = vpack.c.bf16 %v43_v24, %v42_v23  ;;  %v74_v27 = vld [vmem:[%s1151_s1 + $0x1a0] sm:$0xff]  ;;  %v75_v28 = vld [vmem:[%s1151_s1 + $0x1a8] sm:$0xff]  ;;  %v44_v35 = vld [vmem:[%s1151_s1 + $0xb0] sm:$0xff] }
   0x8   :  { %747 = vmatprep.subr.bf16.mxu1 %v746_v17  ;;  %v26_v29 = vld [vmem:[%s1151_s1 + $0x20] sm:$0xff]  ;;  %v750_v30 = vpack.c.bf16 %v75_v28, %v74_v27  ;;  %v27_v31 = vld [vmem:[%s1151_s1 + $0x28] sm:$0xff]  ;;  %v45_v36 = vld [vmem:[%s1151_s1 + $0xb8] sm:$0xff] }
   0x9   :  { %v58_v32 = vld [vmem:[%s1151_s1 + $0x120] sm:$0xff]  ;;  %v59_v33 = vld [vmem:[%s1151_s1 + $0x128] sm:$0xff]  ;;  %v720_v34 = vpack.c.bf16 %v27_v31, %v26_v29  ;;  %v76_v37 = vld [vmem:[%s1151_s1 + $0x1b0] sm:$0xff]  ;;  %v722_v39 = vpack.c.bf16 %v45_v36, %v44_v35 }
   0xa   :  { %717 = vmatpush3.bf16.msra.mxu0 %v716_v21  ;;  %v752_v38 = vpack.c.bf16 %v59_v33, %v58_v32  ;;  %v77_v40 = vld [vmem:[%s1151_s1 + $0x1b8] sm:$0xff]  ;;  %v28_v41 = vld [vmem:[%s1151_s1 + $0x30] sm:$0xff]  ;;  %v46_v46 = vld [vmem:[%s1151_s1 + $0xc0] sm:$0xff] }
   0xb   :  { %749 = vmatpush3.bf16.msra.mxu1 %v748_v25  ;;  %719 = vmatprep.subr.bf16.mxu0 %v718_v26  ;;  %v29_v42 = vld [vmem:[%s1151_s1 + $0x38] sm:$0xff]  ;;  %v754_v43 = vpack.c.bf16 %v77_v40, %v76_v37  ;;  %v60_v44 = vld [vmem:[%s1151_s1 + $0x130] sm:$0xff]  ;;  %v47_v50 = vld [vmem:[%s1151_s1 + $0xc8] sm:$0xff] }
   0xc   :  { %751 = vmatprep.subr.bf16.mxu1 %v750_v30  ;;  %v61_v45 = vld [vmem:[%s1151_s1 + $0x138] sm:$0xff]  ;;  %v78_v51 = vld [vmem:[%s1151_s1 + $0x1c0] sm:$0xff]  ;;  %v79_v52 = vld [vmem:[%s1151_s1 + $0x1c8] sm:$0xff]  ;;  %v724_v53 = vpack.c.bf16 %v29_v42, %v28_v41  ;;  %v726_v55 = vpack.c.bf16 %v47_v50, %v46_v46 }
   0xd   :  { %v756_v54 = vpack.c.bf16 %v61_v45, %v60_v44  ;;  %v30_v56 = vld [vmem:[%s1151_s1 + $0x40] sm:$0xff]  ;;  %v31_v57 = vld [vmem:[%s1151_s1 + $0x48] sm:$0xff]  ;;  %v758_v59 = vpack.c.bf16 %v79_v52, %v78_v51  ;;  %v48_v61 = vld [vmem:[%s1151_s1 + $0xd0] sm:$0xff] }
   0xe   :  { %721 = vmatpush3.bf16.msra.mxu0 %v720_v34  ;;  %v62_v58 = vld [vmem:[%s1151_s1 + $0x140] sm:$0xff]  ;;  %v63_v60 = vld [vmem:[%s1151_s1 + $0x148] sm:$0xff]  ;;  %v49_v62 = vld [vmem:[%s1151_s1 + $0xd8] sm:$0xff]  ;;  %v728_v3 = vpack.c.bf16 %v31_v57, %v30_v56 }
   0xf   :  { %753 = vmatpush3.bf16.msra.mxu1 %v752_v38  ;;  %723 = vmatprep.subr.bf16.mxu0 %v722_v39  ;;  %v80_v1 = vld [vmem:[%s1151_s1 + $0x1d0] sm:$0xff]  ;;  %v81_v2 = vld [vmem:[%s1151_s1 + $0x1d8] sm:$0xff]  ;;  %v760_v4 = vpack.c.bf16 %v63_v60, %v62_v58  ;;  %v730_v5 = vpack.c.bf16 %v49_v62, %v48_v61  ;;  %v50_v11 = vld [vmem:[%s1151_s1 + $0xe0] sm:$0xff] }
  0x10   :  { %755 = vmatprep.subr.bf16.mxu1 %v754_v43  ;;  %v32_v6 = vld [vmem:[%s1151_s1 + $0x50] sm:$0xff]  ;;  %v33_v7 = vld [vmem:[%s1151_s1 + $0x58] sm:$0xff]  ;;  %v762_v9 = vpack.c.bf16 %v81_v2, %v80_v1  ;;  %v51_v12 = vld [vmem:[%s1151_s1 + $0xe8] sm:$0xff] }
  0x11   :  { %v64_v8 = vld [vmem:[%s1151_s1 + $0x150] sm:$0xff]  ;;  %v65_v10 = vld [vmem:[%s1151_s1 + $0x158] sm:$0xff]  ;;  %v82_v14 = vld [vmem:[%s1151_s1 + $0x1e0] sm:$0xff]  ;;  %v732_v16 = vpack.c.bf16 %v33_v7, %v32_v6  ;;  %v734_v20 = vpack.c.bf16 %v51_v12, %v50_v11 }
  0x12   :  { %725 = vmatpush3.bf16.msra.mxu0 %v724_v53  ;;  %v83_v15 = vld [vmem:[%s1151_s1 + $0x1e8] sm:$0xff]  ;;  %v34_v17 = vld [vmem:[%s1151_s1 + $0x60] sm:$0xff]  ;;  %v764_v19 = vpack.c.bf16 %v65_v10, %v64_v8  ;;  %v52_v25 = vld [vmem:[%s1151_s1 + $0xf0] sm:$0xff] }
  0x13   :  { %757 = vmatpush3.bf16.msra.mxu1 %v756_v54  ;;  %727 = vmatprep.subr.bf16.mxu0 %v726_v55  ;;  %v35_v18 = vld [vmem:[%s1151_s1 + $0x68] sm:$0xff]  ;;  %v66_v21 = vld [vmem:[%s1151_s1 + $0x160] sm:$0xff]  ;;  %v766_v24 = vpack.c.bf16 %v83_v15, %v82_v14  ;;  %v53_v26 = vld [vmem:[%s1151_s1 + $0xf8] sm:$0xff] }
  0x14   :  { %759 = vmatprep.subr.bf16.mxu1 %v758_v59  ;;  %v67_v22 = vld [vmem:[%s1151_s1 + $0x168] sm:$0xff]  ;;  %v1038_v23 = vld [vmem:[%s1150_s0] sm:$0xff] }
  0x15   :  { %v94_v27 = vrot.slane %v1038_v23, %v1015_v13  ;;  %v87_v28 = vcombine.high %v1038_v23, %v1038_v23 }
  0x16   :  { %729 = vmatpush3.bf16.msra.mxu0 %v728_v3 }
  0x17   :  { %761 = vmatpush3.bf16.msra.mxu1 %v760_v4  ;;  %731 = vmatprep.subr.bf16.mxu0 %v730_v5 }
  0x18   :  { %763 = vmatprep.subr.bf16.mxu1 %v762_v9 }
  0x19   :  { %10 = vsyncpa [#allocation3], 0  ;;  %v84_v29 = vld [vmem:[%s1151_s1 + $0x1f0] sm:$0xff]  ;;  %v85_v30 = vld [vmem:[%s1151_s1 + $0x1f8] sm:$0xff]  ;;  %v736_v31 = vpack.c.bf16 %v35_v18, %v34_v17  ;;  %v102_v32 = vcombine.high %v94_v27, %v94_v27  ;;  %v101_v33 = vrot.slane %v87_v28, %v1015_v13  ;;  %v768_v34 = vpack.c.bf16 %v67_v22, %v66_v21 }
  0x1a   :  { %733 = vmatpush3.bf16.msra.mxu0 %v732_v16  ;;  %v738_v35 = vpack.c.bf16 %v53_v26, %v52_v25  ;;  %v36_v36 = vld [vmem:[%s1151_s1 + $0x70] sm:$0xff]  ;;  %v37_v37 = vld [vmem:[%s1151_s1 + $0x78] sm:$0xff]  ;;  %v770_v38 = vpack.c.bf16 %v85_v30, %v84_v29  ;;  %v248_v44 = vld [vmem:[%s1152_s2] sm:$0xff]  ;;  %v831_v47 = vmov 0.0|0.0   ;;  %vm832_vm0 = vmmov 0  }
  0x1b   :  { %765 = vmatpush3.bf16.msra.mxu1 %v764_v19  ;;  %735 = vmatprep.subr.bf16.mxu0 %v734_v20  ;;  %v68_v39 = vld [vmem:[%s1151_s1 + $0x170] sm:$0xff]  ;;  %v69_v40 = vld [vmem:[%s1151_s1 + $0x178] sm:$0xff]  ;;  %v103_v41 = vcombine.high %v101_v33, %v101_v33  ;;  %v740_v42 = vpack.c.bf16 %v37_v37, %v36_v36  ;;  %v249_v45 = vld [vmem:[%s1152_s2 + $0x8] sm:$0xff]  ;;  %v833_v51 = vmov 0.0   ;;  %vm332_vm1 = vcmask 1043456  }
  0x1c   :  { %767 = vmatprep.subr.bf16.mxu1 %v766_v24  ;;  %172 = vmatprep.mubr.f32.mxu0 %v102_v32  ;;  %v772_v43 = vpack.c.bf16 %v69_v40, %v68_v39  ;;  %v775_v46 = vpack.c.bf16 %v249_v45, %v248_v44  ;;  %v250_v48 = vld [vmem:[%s1152_s2 + $0x10] sm:$0xff]  ;;  %v251_v49 = vld [vmem:[%s1152_s2 + $0x18] sm:$0xff]  ;;  %v327_v52 = vld [vmem:[%s1153_s3] sm:$0xf]  ;;  %vm252_vm2 = vcmask 261120   ;;  %vm328_vm3 = vcmask 31744  }
  0x1d   :  { %242 = vmatprep.mubr.f32.mxu1 %v103_v41  ;;  %v778_v50 = vpack.c.bf16 %v251_v49, %v250_v48  ;;  %v413_v63 = vld [vmem:[%s1154_s4 + $0x8] sm:$0xff]  ;;  %v415_v1 = vld [vmem:[%s1154_s4 + $0x18] sm:$0xff]  ;;  %v412_v4 = vld [vmem:[%s1154_s4] sm:$0xff] }
  0x1e   :  { %737 = vmatpush3.bf16.msra.mxu0 %v736_v31  ;;  %v417_v0 = vld [vmem:[%s1154_s4 + $0x28] sm:$0xff]  ;;  %v419_v3 = vld [vmem:[%s1154_s4 + $0x38] sm:$0xff]  ;;  %v416_v5 = vld [vmem:[%s1154_s4 + $0x20] sm:$0xff] }
  0x1f   :  { %769 = vmatpush3.bf16.msra.mxu1 %v768_v34  ;;  %739 = vmatprep.subr.bf16.mxu0 %v738_v35  ;;  %v780_v2 = vpack.c.bf16 %v417_v0, %v413_v63  ;;  %v788_v6 = vpack.c.bf16 %v419_v3, %v415_v1  ;;  %v782_v7 = vpack.c.bf16 %v416_v5, %v412_v4  ;;  %v414_v8 = vld [vmem:[%s1154_s4 + $0x10] sm:$0xff]  ;;  %v421_v10 = vld [vmem:[%s1154_s4 + $0x48] sm:$0xff]  ;;  %v423_v14 = vld [vmem:[%s1154_s4 + $0x58] sm:$0xff] }
  0x20   :  { %771 = vmatprep.subr.bf16.mxu1 %v770_v38  ;;  %v418_v9 = vld [vmem:[%s1154_s4 + $0x30] sm:$0xff]  ;;  %v425_v12 = vld [vmem:[%s1154_s4 + $0x68] sm:$0xff]  ;;  %v427_v15 = vld [vmem:[%s1154_s4 + $0x78] sm:$0xff] }
  0x21   :  { %v790_v11 = vpack.c.bf16 %v418_v9, %v414_v8  ;;  %v784_v16 = vpack.c.bf16 %v425_v12, %v421_v10  ;;  %v792_v17 = vpack.c.bf16 %v427_v15, %v423_v14  ;;  %v420_v18 = vld [vmem:[%s1154_s4 + $0x40] sm:$0xff]  ;;  %v422_v20 = vld [vmem:[%s1154_s4 + $0x50] sm:$0xff] }
  0x22   :  { %741 = vmatpush3.bf16.msra.mxu0 %v740_v42  ;;  %v424_v19 = vld [vmem:[%s1154_s4 + $0x60] sm:$0xff]  ;;  %v426_v22 = vld [vmem:[%s1154_s4 + $0x70] sm:$0xff]  ;;  %s834_s4 = smov [#allocation2]  }
  0x23   :  { %773 = vmatpush3.bf16.msra.mxu1 %v772_v43  ;;  %774 = vmatprep.subr.bf16.mxu0 %v831_v47  ;;  %v786_v21 = vpack.c.bf16 %v424_v19, %v420_v18  ;;  %v794_v24 = vpack.c.bf16 %v426_v22, %v422_v20  ;;  %s603_s7 = sshll.u32 %s834_s4, 4  ;;  %s604_s7 = int_to_ptr.vmem [resolvable:$true] %s603_s7 }
  0x24   :  { %705 = vmatprep.subr.mxu1 %v833_v51  ;;  %s806_s8 = scalar_lea.vmem %s604_s7, 128  ;;  %p811_p1 = scmp.lt.s32.totalorder %s604_s7, %s604_s7 }
  0x25   :  { %173 = vmatmul.mubr.f32.vlgmr.msra.gmra.mrb[0].mxu0 %v94_v27  ;;  %p807_p0 = scmp.ne.s32.totalorder %s604_s7, %s806_s8  ;;  %p812_p2 = scmp.lt.s32.totalorder %s806_s8, %s806_s8 }
  0x26   :  { %243 = vmatmul.mubr.f32.vlgmr.msra.gmra.mrb[0].mxu1 %v101_v33  ;;  %776 = vmatpush3.bf16.msra.mxu0 %v775_v46 }
  0x27   :  { %777 = vmatprep.subr.bf16.mxu0 %v831_v47  ;;  %702 = vmatprep.mubr.msk.f32.mxu0 %vm832_vm0, %v833_v51  ;;  %p813_p3 = por %p812_p2, %p811_p1 }
  0x28   :  { %707 = vmatprep.mubr.msk.f32.mxu1 %vm832_vm0, %v833_v51  ;;  %706 = vmatpush3.msk.msra.mxu1 %vm332_vm1, %v327_v52 }
  0x29   :  { %781 = vmatprep.subr.bf16.mxu1 %v780_v2  ;;  %p814_p4 = pnand %p813_p3, %p807_p0 }
  0x2a   :  { %779 = vmatpush3.bf16.msra.mxu0 %v778_v50 }
  0x2b   :  { %789 = vmatprep.subr.bf16.mxu0 %v788_v6 }
  0xf8   :  { %v649_v53 = vpop.f32.mrb[0].mxu0 }
  0xf9   :  { %v684_v54 = vpop.f32.mrb[0].mxu1  ;;  %v650_v55 = vpop.f32.mrb[1].mxu0 }
  0xfa   :  { %v651_v56 = vadd.f32 %v650_v55, %v649_v53  ;;  %v685_v57 = vpop.f32.mrb[1].mxu1 }
  0xfb   :  { %v686_v58 = vadd.f32 %v685_v57, %v684_v54 }
  0xfd   :  { %v245_v59 = vadd.f32 %v686_v58, %v651_v56 }
  0xff   :  { %703 = vmatmul.mubr.msk.f32.vlgmr.msra.gmra.mrb[2].mxu0 %vm252_vm2, %v245_v59 }
 0x100   :  { %566 = vmatprep.mubr.f32.mxu0 %v833_v51  ;;  %791 = vmatpush1.bf16.msra.mxu0 %v790_v11 }
 0x101   :  { %793 = vmatprep.subr.bf16.mxu0 %v792_v17 }
 0x104   :  { %795 = vmatpush1.bf16.msra.mxu0 %v794_v24 }
 0x1d2   :  { %v322_v60 = vpop.f32.mrb[2].mxu0 }
 0x1d3   :  { %v326_v61 = vmax.f32 %v322_v60, 0.0  ;;  %v704_v62 = vpop.f32.mrb[3].mxu0 }
 0x1d5   :  { %708 = vmatmul.mubr.msk.f32.vlgmr.msra.gmra.mrb[2].mxu1 %vm328_vm3, %v326_v61 }
 0x1d6   :  { %495 = vmatprep.mubr.f32.mxu1 %v833_v51  ;;  %783 = vmatpush1.bf16.msra.mxu1 %v782_v7 }
 0x1d7   :  { %785 = vmatprep.subr.bf16.mxu1 %v784_v16 }
 0x1da   :  { %787 = vmatpush1.bf16.msra.mxu1 %v786_v21 }
 0x2a8   :  { %v402_v25 = vpop.f32.mrb[2].mxu1 }
 0x2a9   :  { %v614_v26 = vmul.f32 -1.442695, %v402_v25  ;;  %v709_v27 = vpop.f32.mrb[3].mxu1 }
 0x2ab   :  { %802 = vpow2.f32 %v614_v26 }
 0x2b5   :  { %v803_v28 = vpop.eup %802 }
 0x2b6   :  { %v409_v29 = vadd.f32 1.0, %v803_v28 }
 0x2b8   :  { %804 = vrcp.f32 %v409_v29 }
 0x2c2   :  { %v805_v30 = vpop.eup %804 }
 0x2c3   :  { %615 = vmatmul.mubr.msk.f32.vlgmr.msra.gmra.mrb[4].mxu1 %vm252_vm2, %v805_v30  ;;  %616 = vmatmul.mubr.msk.f32.vlgmr.msra.gmra.mrb[4].mxu0 %vm252_vm2, %v805_v30 }
 0x396   :  { %v497_v31 = vpop.f32.mrb[4].mxu1  ;;  %v568_v32 = vpop.f32.mrb[4].mxu0 }
 0x397   :  { %v499_v33 = vpop.f32.mrb[5].mxu1  ;;  %v570_v34 = vpop.f32.mrb[5].mxu0 }
 0x398   :  { %v577_v35 = vcombine.low %v497_v31, %v499_v33  ;;  %v578_v36 = vcombine.low %v568_v32, %v570_v34 }
 0x39a   :  { %v585_v37 = vrot.slane %v577_v35, %v1015_v13  ;;  %v592_v38 = vrot.slane %v578_v36, %v1015_v13 }
 0x39c   :  { %v593_v39 = vcombine.low %v585_v37, %v592_v38 }
 0x39e   :  { %v595_v40 = vmul.f32 %v593_v39, %v1038_v23 }
 0x3a0   :  { %596 = vst [vmem:[#allocation2] sm:$0xff] %v595_v40 }
 0x3a1   :  { %817 = shalt.err (!%p814_p4)
}
 0x3a2   :  { %s818_s11 = scalar_lea.hbm %s1155_s5, 128 }
 0x3a3   :  { %p819_p5 = scmp.ne.s32.totalorder %s1155_s5, %s818_s11  ;;  %p822_p6 = scmp.lt.u32.totalorder %s818_s11, %s1155_s5 }
 0x3a5   :  { %p824_p7 = pnand %p822_p6, %p819_p5 }
 0x3a7   :  { %827 = shalt.err (!%p824_p7)
}
 0x3a8   :  { %606 = dma.vmem_to_hbm [thread:$0]  %s604_s7, 128, %s1155_s5, [#allocation3]  }
 0x3a9   :  { %828 = dma.done.wait [#allocation3], 128  }
 0x3aa   :  { %829 = vsyncadd [#allocation3], 4294967168 }
 0x3ab   :  { %610 = vsyncpa [#allocation3], 1 }

</bundles_post_ra>
